<compile_context>
chip_gen: v7x
topology: tpu7x:2x2x1
jax: 0.10.0
libtpu: 0.0.40
codegen_flags: <defaults>
</compile_context>

<pallas_src>
import functools

import jax
import jax.numpy as jnp
from jax.experimental import pallas as pl
from jax.experimental.pallas import tpu as pltpu


LANE = 128      # TPU lane width (last-dim tiling unit)
SUBLANE = 8     # TPU sublane width (second-to-last-dim tiling unit)


def _round_up(n: int, m: int) -> int:
    return ((n + m - 1) // m) * m


def _mlp_kernel(x_ref, w1_ref, b1_ref, w2_ref, b2_ref, o_ref):
    # Layer 1: Linear + ReLU.  bf16 operands, f32 MXU accumulation.
    h = jnp.dot(x_ref[...], w1_ref[...], preferred_element_type=jnp.float32)
    h = jnp.maximum(h + b1_ref[...], 0.0)               # f32 VPU epilogue
    # Layer 2: Linear + ReLU.  Cast activations back to bf16 for the MXU only.
    y = jnp.dot(h.astype(w2_ref.dtype), w2_ref[...],
                preferred_element_type=jnp.float32)
    y = jnp.maximum(y + b2_ref[...], 0.0)                # f32 VPU epilogue
    o_ref[...] = y.astype(o_ref.dtype)


@functools.partial(jax.jit, static_argnames=("compute_dtype", "batch_tile"))
def dqn_tab_forward(x, w1, b1, w2, b2, *,
                    compute_dtype=jnp.bfloat16, batch_tile=256):
    """x: (B, D_in); w1: (D_in, 4H); b1: (1, 4H); w2: (4H, H); b2: (1, H).

    Returns f32 (B, H).  Internally pads features to multiples of 128 lanes and
    the batch to a multiple of the batch tile; padding is zero-filled so the
    math is unchanged in the valid region.
    """
    B, D_in = x.shape
    H1 = w1.shape[1]
    H2 = w2.shape[1]

    # Lane-dense padded feature dims.
    d_pad = _round_up(D_in, LANE)
    h1_pad = _round_up(H1, LANE)
    h2_pad = _round_up(H2, LANE)

    # Batch tile: multiple of 8 sublanes, capped at `batch_tile` rows so the
    # double-buffered (x + out) tiles stay tiny in VMEM even on v7x (64 MiB).
    tb = min(_round_up(batch_tile, SUBLANE), _round_up(B, SUBLANE))
    b_pad = _round_up(B, tb)
    num_tiles = pl.cdiv(b_pad, tb)

    # Zero-pad + cast operands.  Biases stay f32 for the VPU epilogue.
    xp = jnp.zeros((b_pad, d_pad), compute_dtype).at[:B, :D_in].set(
        x.astype(compute_dtype))
    w1p = jnp.zeros((d_pad, h1_pad), compute_dtype).at[:D_in, :H1].set(
        w1.astype(compute_dtype))
    b1p = jnp.zeros((1, h1_pad), jnp.float32).at[:, :H1].set(
        b1.reshape(1, H1).astype(jnp.float32))
    w2p = jnp.zeros((h1_pad, h2_pad), compute_dtype).at[:H1, :H2].set(
        w2.astype(compute_dtype))
    b2p = jnp.zeros((1, h2_pad), jnp.float32).at[:, :H2].set(
        b2.reshape(1, H2).astype(jnp.float32))

    out_padded = pl.pallas_call(
        _mlp_kernel,
        out_shape=jax.ShapeDtypeStruct((b_pad, h2_pad), jnp.float32),
        grid=(num_tiles,),
        in_specs=[
            # x: streamed per batch tile (pipelined against compute).
            pl.BlockSpec((tb, d_pad), lambda i: (i, 0)),
            # Weights / biases: constant index_map -> VMEM-resident across grid.
            pl.BlockSpec((d_pad, h1_pad), lambda i: (0, 0)),
            pl.BlockSpec((1, h1_pad), lambda i: (0, 0)),
            pl.BlockSpec((h1_pad, h2_pad), lambda i: (0, 0)),
            pl.BlockSpec((1, h2_pad), lambda i: (0, 0)),
        ],
        out_specs=pl.BlockSpec((tb, h2_pad), lambda i: (i, 0)),
        compiler_params=pltpu.CompilerParams(
            # Independent batch tiles -> megacore-shardable on v7x.
            dimension_semantics=("parallel",),
        ),
    )(xp, w1p, b1p, w2p, b2p)

    return out_padded[:B, :H2]


def init_params(key, in_dim, hidden_dim):
    """Deterministic init mimicking nn.Linear's uniform(+/- 1/sqrt(fan_in))."""
    h1 = 4 * hidden_dim
    h2 = hidden_dim
    k1, k2, k3, k4 = jax.random.split(key, 4)
    bound1 = 1.0 / (in_dim ** 0.5)
    bound2 = 1.0 / (h1 ** 0.5)
    # Stored as [in_features, out_features] (transposed relative to PyTorch).
    w1 = jax.random.uniform(k1, (in_dim, h1), jnp.float32, -bound1, bound1)
    b1 = jax.random.uniform(k2, (1, h1), jnp.float32, -bound1, bound1)
    w2 = jax.random.uniform(k3, (h1, h2), jnp.float32, -bound2, bound2)
    b2 = jax.random.uniform(k4, (1, h2), jnp.float32, -bound2, bound2)
    return w1, b1, w2, b2


if __name__ == "__main__":
    # Small shapes consistent with the module: env.arrayinfo_shape=32, hidden_dim=16.
    batch = 8
    in_dim = 32
    hidden_dim = 16

    key = jax.random.PRNGKey(0)
    kx, kp = jax.random.split(key)
    x = jax.random.normal(kx, (batch, in_dim), dtype=jnp.float32)
    w1, b1, w2, b2 = init_params(kp, in_dim, hidden_dim)

    out = dqn_tab_forward(x, w1, b1, w2, b2)
    out = jax.block_until_ready(out)
    assert out.shape == (batch, hidden_dim)

    # Reference with matching precision (bf16 operands, f32 accumulation).
    bf = jnp.bfloat16
    h_ref = jnp.maximum(
        jnp.dot(x.astype(bf), w1.astype(bf),
                preferred_element_type=jnp.float32) + b1, 0.0)
    ref_bf16 = jnp.maximum(
        jnp.dot(h_ref.astype(bf), w2.astype(bf),
                preferred_element_type=jnp.float32) + b2, 0.0)
    assert jnp.allclose(out, ref_bf16, atol=1e-5, rtol=1e-5)

    # Coarse check vs. the exact f32 nn.Sequential math (bf16 rounding slack).
    ref_f32 = jnp.maximum(jnp.maximum(x @ w1 + b1, 0.0) @ w2 + b2, 0.0)
    assert jnp.allclose(out, ref_f32, atol=5e-2, rtol=5e-2)

    print("KERNEL_OK")
</pallas_src>

<mosaic_0001>
module attributes {stable_mosaic.version = 11 : i64} {
  func.func @_mlp_kernel(%arg0: i32, %arg1: memref<8x128xbf16, #tpu.memory_space<vmem>>, %arg2: memref<128x128xbf16, #tpu.memory_space<vmem>>, %arg3: memref<1x128xf32, #tpu.memory_space<vmem>>, %arg4: memref<128x128xbf16, #tpu.memory_space<vmem>>, %arg5: memref<1x128xf32, #tpu.memory_space<vmem>>, %arg6: memref<8x128xf32, #tpu.memory_space<vmem>>) attributes {dimension_semantics = [#tpu.dimension_semantics<parallel>], iteration_bounds = array<i64: 1>, scalar_prefetch = 0 : i64, scratch_operands = 0 : i64, tpu.core_type = #tpu.core_type<tc>, window_params = [{transform_indices = @transform_0, window_bounds = array<i64: 8, 128>}, {pipeline_mode = #tpu.pipeline_mode<synchronous>, transform_indices = @transform_1, window_bounds = array<i64: 128, 128>}, {pipeline_mode = #tpu.pipeline_mode<synchronous>, transform_indices = @transform_2, window_bounds = array<i64: 1, 128>}, {pipeline_mode = #tpu.pipeline_mode<synchronous>, transform_indices = @transform_3, window_bounds = array<i64: 128, 128>}, {pipeline_mode = #tpu.pipeline_mode<synchronous>, transform_indices = @transform_4, window_bounds = array<i64: 1, 128>}, {transform_indices = @transform_5, window_bounds = array<i64: 8, 128>}]} {
    %c0 = arith.constant 0 : index
    %c0_0 = arith.constant 0 : index
    %0 = vector.load %arg1[%c0, %c0_0] : memref<8x128xbf16, #tpu.memory_space<vmem>>, vector<8x128xbf16>
    %c0_1 = arith.constant 0 : index
    %c0_2 = arith.constant 0 : index
    %1 = vector.load %arg2[%c0_1, %c0_2] : memref<128x128xbf16, #tpu.memory_space<vmem>>, vector<128x128xbf16>
    %cst = arith.constant dense<0.000000e+00> : vector<8x128xf32>
    %2 = tpu.matmul %0, %1, %cst {dimension_numbers = #tpu.dot_dimension_numbers<[1], [0], [0], [1], [0, 0, 1, 1], [], []>} : vector<8x128xbf16>, vector<128x128xbf16>, vector<8x128xf32> -> vector<8x128xf32>
    %c0_3 = arith.constant 0 : index
    %c0_4 = arith.constant 0 : index
    %3 = vector.load %arg3[%c0_3, %c0_4] : memref<1x128xf32, #tpu.memory_space<vmem>>, vector<1x128xf32>
    %4 = vector.broadcast %3 : vector<1x128xf32> to vector<8x128xf32>
    %5 = arith.addf %2, %4 : vector<8x128xf32>
    %cst_5 = arith.constant 0.000000e+00 : f32
    %6 = vector.broadcast %cst_5 : f32 to vector<8x128xf32>
    %7 = arith.maximumf %5, %6 : vector<8x128xf32>
    %8 = arith.truncf %7 : vector<8x128xf32> to vector<8x128xbf16>
    %c0_6 = arith.constant 0 : index
    %c0_7 = arith.constant 0 : index
    %9 = vector.load %arg4[%c0_6, %c0_7] : memref<128x128xbf16, #tpu.memory_space<vmem>>, vector<128x128xbf16>
    %cst_8 = arith.constant dense<0.000000e+00> : vector<8x128xf32>
    %10 = tpu.matmul %8, %9, %cst_8 {dimension_numbers = #tpu.dot_dimension_numbers<[1], [0], [0], [1], [0, 0, 1, 1], [], []>} : vector<8x128xbf16>, vector<128x128xbf16>, vector<8x128xf32> -> vector<8x128xf32>
    %c0_9 = arith.constant 0 : index
    %c0_10 = arith.constant 0 : index
    %11 = vector.load %arg5[%c0_9, %c0_10] : memref<1x128xf32, #tpu.memory_space<vmem>>, vector<1x128xf32>
    %12 = vector.broadcast %11 : vector<1x128xf32> to vector<8x128xf32>
    %13 = arith.addf %10, %12 : vector<8x128xf32>
    %cst_11 = arith.constant 0.000000e+00 : f32
    %14 = vector.broadcast %cst_11 : f32 to vector<8x128xf32>
    %15 = arith.maximumf %13, %14 : vector<8x128xf32>
    %c0_12 = arith.constant 0 : index
    %c0_13 = arith.constant 0 : index
    %16 = vector.load %arg6[%c0_12, %c0_13] : memref<8x128xf32, #tpu.memory_space<vmem>>, vector<8x128xf32>
    tpu.vector_store %arg6[%c0_12, %c0_13], %15 {strides = array<i32>} : memref<8x128xf32, #tpu.memory_space<vmem>>, vector<8x128xf32>,
    return
  }
  func.func @transform_0(%arg0: i32) -> (i32, i32) {
    %c0_i32 = arith.constant 0 : i32
    %c0_i32_0 = arith.constant 0 : i32
    return %arg0, %c0_i32 : i32, i32
  }
  func.func @transform_1(%arg0: i32) -> (i32, i32) {
    %c0_i32 = arith.constant 0 : i32
    %c0_i32_0 = arith.constant 0 : i32
    %c0_i32_1 = arith.constant 0 : i32
    return %c0_i32, %c0_i32_0 : i32, i32
  }
  func.func @transform_2(%arg0: i32) -> (i32, i32) {
    %c0_i32 = arith.constant 0 : i32
    %c0_i32_0 = arith.constant 0 : i32
    %c0_i32_1 = arith.constant 0 : i32
    return %c0_i32, %c0_i32_0 : i32, i32
  }
  func.func @transform_3(%arg0: i32) -> (i32, i32) {
    %c0_i32 = arith.constant 0 : i32
    %c0_i32_0 = arith.constant 0 : i32
    %c0_i32_1 = arith.constant 0 : i32
    return %c0_i32, %c0_i32_0 : i32, i32
  }
  func.func @transform_4(%arg0: i32) -> (i32, i32) {
    %c0_i32 = arith.constant 0 : i32
    %c0_i32_0 = arith.constant 0 : i32
    %c0_i32_1 = arith.constant 0 : i32
    return %c0_i32, %c0_i32_0 : i32, i32
  }
  func.func @transform_5(%arg0: i32) -> (i32, i32) {
    %c0_i32 = arith.constant 0 : i32
    %c0_i32_0 = arith.constant 0 : i32
    return %arg0, %c0_i32 : i32, i32
  }
}

</mosaic_0001>

<bundles_post_ra>
// kernel: dqn_tab_forward.1
= control target key start
LH: loop header
LB: loop body
LE: loop exit
PB: predicated region body
PF: predicated region fallthrough
CT: control target
= control target key end

     0   :  { %v382_v1 = vmov 0.0   ;;  %vm383_vm0 = vmmov 0   ;;  %s484_s0 = inlined_call_operand.vmem [shape: bf16[8,128], index: 0, kind: input, shape index: {}]   ;;  %s485_s1 = inlined_call_operand.vmem [shape: bf16[128,128], index: 1, kind: input, shape index: {}]   ;;  %s486_s2 = inlined_call_operand.vmem [shape: f32[1,128], index: 2, kind: input, shape index: {}]   ;;  %s487_s3 = inlined_call_operand.vmem [shape: bf16[128,128], index: 3, kind: input, shape index: {}]   ;;  %s488_s4 = inlined_call_operand.vmem [shape: f32[1,128], index: 4, kind: input, shape index: {}]   ;;  %s489_s5 = inlined_call_operand.hbm [shape: f32[8,128], index: 5, kind: output, shape index: {}]  }
   0x1   :  { %v342_v0 = vld [vmem:[%s485_s1] sm:$0xff]   ;;  %299 = vmatprep.subr.bf16.mxu0 %v382_v1  ;;  %319 = vmatprep.subr.bf16.mxu1 %v382_v1  ;;  %v343_v2 = vld [vmem:[%s485_s1 + $0x8] sm:$0xff]   ;;  %v344_v3 = vld [vmem:[%s485_s1 + $0x10] sm:$0xff]  }
   0x2   :  { %300 = vmatpush3.bf16.msra.mxu0 %v342_v0  ;;  %315 = vmatprep.mubr.msk.bf16.mxu0 %vm383_vm0, %v382_v1  ;;  %v350_v4 = vld [vmem:[%s487_s3] sm:$0xff]   ;;  %v345_v5 = vld [vmem:[%s485_s1 + $0x18] sm:$0xff]   ;;  %v351_v6 = vld [vmem:[%s487_s3 + $0x8] sm:$0xff]  }
   0x3   :  { %301 = vmatprep.subr.bf16.mxu0 %v382_v1  ;;  %335 = vmatprep.mubr.msk.bf16.mxu1 %vm383_vm0, %v382_v1  ;;  %v346_v7 = vld [vmem:[%s485_s1 + $0x20] sm:$0xff]   ;;  %v352_v8 = vld [vmem:[%s487_s3 + $0x10] sm:$0xff]  }
   0x4   :  { %320 = vmatpush3.bf16.msra.mxu1 %v350_v4 }
   0x5   :  { %321 = vmatprep.subr.bf16.mxu1 %v382_v1 }
   0x6   :  { %302 = vmatpush3.bf16.msra.mxu0 %v343_v2 }
   0x7   :  { %303 = vmatprep.subr.bf16.mxu0 %v382_v1 }
   0x8   :  { %322 = vmatpush3.bf16.msra.mxu1 %v351_v6 }
   0x9   :  { %323 = vmatprep.subr.bf16.mxu1 %v382_v1 }
   0xa   :  { %304 = vmatpush3.bf16.msra.mxu0 %v344_v3 }
   0xb   :  { %305 = vmatprep.subr.bf16.mxu0 %v382_v1 }
   0xe   :  { %306 = vmatpush3.bf16.msra.mxu0 %v345_v5 }
   0xf   :  { %307 = vmatprep.subr.bf16.mxu0 %v382_v1 }
  0x10   :  { %10 = vsyncpa [#allocation3], 0  ;;  %v347_v9 = vld [vmem:[%s485_s1 + $0x28] sm:$0xff]   ;;  %324 = vmatpush3.bf16.msra.mxu1 %v352_v8  ;;  %v353_v10 = vld [vmem:[%s487_s3 + $0x18] sm:$0xff]   ;;  %s384_s29 = smov [#allocation2]  }
  0x11   :  { %325 = vmatprep.subr.bf16.mxu1 %v382_v1  ;;  %v348_v11 = vld [vmem:[%s485_s1 + $0x30] sm:$0xff]   ;;  %v354_v12 = vld [vmem:[%s487_s3 + $0x20] sm:$0xff]   ;;  %v349_v13 = vld [vmem:[%s485_s1 + $0x38] sm:$0xff]  }
  0x12   :  { %308 = vmatpush3.bf16.msra.mxu0 %v346_v7  ;;  %v355_v14 = vld [vmem:[%s487_s3 + $0x28] sm:$0xff]   ;;  %v22_v15 = vld [vmem:[%s484_s0] sm:$0xf]  ;;  %v356_v16 = vld [vmem:[%s487_s3 + $0x30] sm:$0xff]  }
  0x13   :  { %309 = vmatprep.subr.bf16.mxu0 %v382_v1  ;;  %v357_v17 = vld [vmem:[%s487_s3 + $0x38] sm:$0xff]   ;;  %v263_v18 = vld [vmem:[%s486_s2] ss:$0 sm:$0xff]  ;;  %s255_s3 = sshll.u32 %s384_s29, 4  ;;  %s256_s3 = int_to_ptr.vmem [resolvable:$true] %s255_s3 }
  0x14   :  { %326 = vmatpush3.bf16.msra.mxu1 %v353_v10  ;;  %v272_v26 = vld [vmem:[%s488_s4] ss:$0 sm:$0xff]  ;;  %s358_s2 = scalar_lea.vmem %s256_s3, 128  ;;  %p363_p1 = scmp.lt.s32.totalorder %s256_s3, %s256_s3 }
  0x15   :  { %327 = vmatprep.subr.bf16.mxu1 %v382_v1  ;;  %p359_p0 = scmp.ne.s32.totalorder %s256_s3, %s358_s2  ;;  %p364_p2 = scmp.lt.s32.totalorder %s358_s2, %s358_s2 }
  0x16   :  { %310 = vmatpush3.bf16.msra.mxu0 %v347_v9 }
  0x17   :  { %311 = vmatprep.subr.bf16.mxu0 %v382_v1  ;;  %p365_p3 = por %p364_p2, %p363_p1 }
  0x18   :  { %328 = vmatpush3.bf16.msra.mxu1 %v354_v12 }
  0x19   :  { %329 = vmatprep.subr.bf16.mxu1 %v382_v1  ;;  %p366_p4 = pnand %p365_p3, %p359_p0 }
  0x1a   :  { %312 = vmatpush3.bf16.msra.mxu0 %v348_v11 }
  0x1b   :  { %313 = vmatprep.subr.bf16.mxu0 %v382_v1 }
  0x1c   :  { %330 = vmatpush3.bf16.msra.mxu1 %v355_v14 }
  0x1d   :  { %331 = vmatprep.subr.bf16.mxu1 %v382_v1 }
  0x1e   :  { %314 = vmatpush3.bf16.msra.mxu0 %v349_v13 }
  0x20   :  { %332 = vmatpush3.bf16.msra.mxu1 %v356_v16 }
  0x21   :  { %316 = vmatmul.mubr.bf16.vlgmr.msra.gmra.mrb[0].mxu0 %v22_v15  ;;  %333 = vmatprep.subr.bf16.mxu1 %v382_v1 }
  0x24   :  { %334 = vmatpush3.bf16.msra.mxu1 %v357_v17 }
  0xf4   :  { %v128_v19 = vpop.f32.mrb[0].mxu0 }
  0xf5   :  { %v129_v20 = vadd.f32 %v263_v18, %v128_v19  ;;  %v317_v21 = vpop.f32.mrb[1].mxu0 }
  0xf6   :  { %v131_v22 = vpop.f32.mrb[2].mxu0 }
  0xf7   :  { %v134_v23 = vmax.f32 %v129_v20, 0.0  ;;  %v318_v24 = vpop.f32.mrb[3].mxu0 }
  0xf9   :  { %v135_v25 = vpack.c.bf16 %v134_v23, %v134_v23 }
  0xfb   :  { %336 = vmatmul.mubr.bf16.vlgmr.msra.gmra.mrb[0].mxu1 %v135_v25 }
 0x1ce   :  { %v241_v27 = vpop.f32.mrb[0].mxu1 }
 0x1cf   :  { %v242_v28 = vadd.f32 %v272_v26, %v241_v27  ;;  %v337_v29 = vpop.f32.mrb[1].mxu1 }
 0x1d0   :  { %v244_v30 = vpop.f32.mrb[2].mxu1 }
 0x1d1   :  { %v247_v31 = vmax.f32 %v242_v28, 0.0  ;;  %v338_v32 = vpop.f32.mrb[3].mxu1 }
 0x1d3   :  { %248 = vst [vmem:[#allocation2] sm:$0xff] %v247_v31 }
 0x1d4   :  { %369 = shalt.err (!%p366_p4)
}
 0x1d5   :  { %s370_s4 = scalar_lea.hbm %s489_s5, 128 }
 0x1d6   :  { %p371_p5 = scmp.ne.s32.totalorder %s489_s5, %s370_s4  ;;  %p374_p6 = scmp.lt.u32.totalorder %s370_s4, %s489_s5 }
 0x1d8   :  { %p376_p7 = pnand %p374_p6, %p371_p5 }
 0x1da   :  { %379 = shalt.err (!%p376_p7)
}
 0x1db   :  { %258 = dma.vmem_to_hbm [thread:$0]  %s256_s3, 128, %s489_s5, [#allocation3]  }
 0x1dc   :  { %380 = dma.done.wait [#allocation3], 128  }
 0x1dd   :  { %381 = vsyncadd [#allocation3], 4294967168 }
 0x1de   :  { %262 = vsyncpa [#allocation3], 1 }

</bundles_post_ra>
